<compile_context>
chip_gen: v5e
topology: v5e:2x2
jax: 0.10.0
libtpu: 0.0.40
codegen_flags: <defaults>
</compile_context>

<pallas_src>
import math

import jax
import jax.numpy as jnp
from jax import lax
from jax.experimental import pallas as pl
from jax.experimental.pallas import tpu as pltpu

_LANE = 128


def _round_up(v, m):
    return (v + m - 1) // m * m


def _pad2d(arr, rows, cols, dtype):
    r, c = arr.shape
    arr = arr.astype(dtype)
    if r == rows and c == cols:
        return arr
    return jnp.zeros((rows, cols), dtype=dtype).at[:r, :c].set(arr)


def _vmem_capacity_bytes():
    """Physical VMEM per core; conservative v7x default if the query fails."""
    try:
        return int(pltpu.get_tpu_info().vmem_capacity_bytes)
    except Exception:
        return 64 * 1024 * 1024


def _vmem_budget_bytes():
    cap = _vmem_capacity_bytes()
    # Leave headroom for compiler internals; cap at ~100 MiB on v5e/v6e.
    return max(min(cap - (16 << 20), 100 << 20), 32 << 20)


def _choose_tiles(n_nodes, tile_m, tile_k):
    """Clamp tiles to the graph size and guarantee >=2 row tiles when possible
    (so v7x's two TensorCores both get work on the 'parallel' row axis)."""
    n_lane = _round_up(n_nodes, _LANE)
    tile_k = _round_up(min(tile_k, n_lane), _LANE)
    tile_m = _round_up(min(tile_m, n_lane), _LANE)
    while (n_lane > _LANE
           and _round_up(n_nodes, tile_m) // tile_m < 2
           and tile_m > _LANE):
        tile_m = _round_up(tile_m // 2, _LANE)
    return tile_m, tile_k


def _stage2_vmem_bytes(tile_m, tile_k, xw_rows, f_pad, resident):
    sup = tile_m * tile_k * 2 * 2                    # bf16, double-buffered
    xw = (xw_rows if resident else tile_k) * f_pad * 2 * 2
    out = tile_m * f_pad * 4 * 2                     # f32, double-buffered
    acc = tile_m * f_pad * 4                         # f32 scratch
    return sup + xw + out + acc


def prepare_support(support, *, tile_m=512, tile_k=2048):
    """One-time (per graph) pad + bf16 cast of the dense adjacency.

    Hoisted out of the per-call hot path: the f32->bf16 pad/cast is a full
    N^2 read+write which would otherwise dominate an HBM-bound kernel call.
    Returns (support_padded, tile_m, tile_k) to pass to graph_convolution.
    """
    n = support.shape[0]
    assert support.shape == (n, n)
    tm, tk = _choose_tiles(n, tile_m, tile_k)
    sup_p = _pad2d(support, _round_up(n, tm), _round_up(n, tk), jnp.bfloat16)
    return sup_p, tm, tk


# ---------------------------------------------------------------------------
# Stage 2 kernel: out = ReLU(L2_normalize_rows(support @ xw)), tiled
# (row tiles, k tiles) with a resident f32 accumulator; normalize + ReLU fused
# on the last k step.  xw is either the full VMEM-resident array (sliced with
# pl.ds) or a per-k streamed block, decided statically from the ref shape.
# ---------------------------------------------------------------------------
def _gcn_agg_kernel(support_ref, xw_ref, out_ref, acc_ref):
    k = pl.program_id(1)
    tile_k = support_ref.shape[1]

    @pl.when(k == 0)
    def _init():
        acc_ref[...] = jnp.zeros_like(acc_ref)

    if xw_ref.shape[0] == tile_k:
        # streamed: the block already is the k-th chunk
        xw_blk = xw_ref[...]
    else:
        # VMEM-resident: slice the k-th chunk out of the full array
        start = pl.multiple_of(k * tile_k, tile_k)
        xw_blk = xw_ref[pl.ds(start, tile_k), :]

    acc_ref[...] += jnp.dot(
        support_ref[...], xw_blk, preferred_element_type=jnp.float32
    )

    @pl.when(k == pl.num_programs(1) - 1)
    def _finalize():
        z = acc_ref[...]  # f32, (tile_m, F_pad); padded cols are exactly zero
        sq = jnp.sum(z * z, axis=-1, keepdims=True)
        # rsqrt(max(sq, eps^2)) == 1 / max(sqrt(sq), eps): matches F.normalize.
        inv = lax.rsqrt(jnp.maximum(sq, 1e-24))
        out_ref[...] = jnp.maximum(z * inv, 0.0).astype(out_ref.dtype)


def graph_convolution(support_p, x, weight, *, n_nodes, tile_m, tile_k):
    """support_p: pre-padded bf16 adjacency from prepare_support,
    x: [N, D] features, weight: [D, F]."""
    n = n_nodes
    d = x.shape[1]
    f_out = weight.shape[1]
    n_pad_m, n_pad_k = support_p.shape
    assert n_pad_m == _round_up(n, tile_m) and n_pad_k == _round_up(n, tile_k)

    f_pad = _round_up(f_out, _LANE)          # lane-dense output, 128 is enough
    rows = n_pad_m // tile_m
    cols = n_pad_k // tile_k

    # Stage 1 (negligible: N*D*F vs N^2*F flops) -> plain XLA matmul in f32,
    # then pad + cast to bf16 for streaming / residency in stage 2.
    xw = jnp.dot(x.astype(jnp.float32), weight.astype(jnp.float32),
                 preferred_element_type=jnp.float32)
    xw_p = _pad2d(xw, n_pad_k, f_pad, jnp.bfloat16)

    budget = _vmem_budget_bytes()
    resident = _stage2_vmem_bytes(tile_m, tile_k, n_pad_k, f_pad, True) <= budget

    if resident:
        # whole xw lives in VMEM for the entire grid (constant index_map)
        xw_spec = pl.BlockSpec((n_pad_k, f_pad), lambda i, k: (0, 0))
        xw_hbm_bytes = n_pad_k * f_pad * 2
    else:
        # fallback: stream the k-th chunk (re-read once per row tile)
        xw_spec = pl.BlockSpec((tile_k, f_pad), lambda i, k: (k, 0))
        xw_hbm_bytes = rows * n_pad_k * f_pad * 2

    out_p = pl.pallas_call(
        _gcn_agg_kernel,
        out_shape=jax.ShapeDtypeStruct((n_pad_m, f_pad), jnp.float32),
        grid_spec=pltpu.PrefetchScalarGridSpec(
            num_scalar_prefetch=0,
            grid=(rows, cols),
            in_specs=[
                # dominant HBM stream: contiguous tile_k along the fast axis
                pl.BlockSpec((tile_m, tile_k), lambda i, k: (i, k)),
                xw_spec,
            ],
            out_specs=pl.BlockSpec((tile_m, f_pad), lambda i, k: (i, 0)),
            scratch_shapes=[pltpu.VMEM((tile_m, f_pad), jnp.float32)],
        ),
        compiler_params=pltpu.CompilerParams(
            dimension_semantics=("parallel", "arbitrary"),
            vmem_limit_bytes=int(budget),
        ),
        cost_estimate=pl.CostEstimate(
            flops=2 * n_pad_m * n_pad_k * f_pad,
            transcendentals=n_pad_m,
            bytes_accessed=n_pad_m * n_pad_k * 2
            + xw_hbm_bytes
            + n_pad_m * f_pad * 4,
        ),
    )(support_p, xw_p)

    return out_p[:n, :f_out]


def xavier_uniform(key, shape, dtype=jnp.float32):
    fan_in, fan_out = shape
    limit = math.sqrt(6.0 / (fan_in + fan_out))
    return jax.random.uniform(key, shape, dtype, minval=-limit, maxval=limit)


def reference(support, x, weight):
    z = (support @ x) @ weight
    denom = jnp.maximum(jnp.linalg.norm(z, axis=-1, keepdims=True), 1e-12)
    return jnp.maximum(z / denom, 0.0)


if __name__ == "__main__":
    key = jax.random.PRNGKey(0)
    k_x, k_a, k_w = jax.random.split(key, 3)

    N = 256     # graph nodes
    D = 64      # input feature dim
    F_out = 16  # output feature dim

    x = jax.random.normal(k_x, (N, D), dtype=jnp.float32)
    # synthetic symmetric, roughly normalized dense adjacency
    a = jax.random.uniform(k_a, (N, N), dtype=jnp.float32)
    support = (a + a.T) / (2.0 * N)
    weight = xavier_uniform(k_w, (D, F_out))

    # One-time pad/cast of the adjacency (hoisted out of the hot path).
    # Small tiles at this demo size so the run exercises both grid axes
    # (2 row tiles x 2 accumulation steps) plus the resident-xw path.
    sup_p, tile_m, tile_k = prepare_support(support, tile_m=512, tile_k=128)

    out = graph_convolution(sup_p, x, weight, n_nodes=N,
                            tile_m=tile_m, tile_k=tile_k)
    out = jax.block_until_ready(out)

    ref = reference(support, x, weight)
    assert out.shape == (N, F_out)
    max_err = float(jnp.max(jnp.abs(out - ref)))
    # bf16 streamed operands -> looser tolerance than a pure-f32 pipeline.
    assert jnp.allclose(out, ref, atol=2e-2, rtol=2e-2), f"max abs err {max_err}"
    print("KERNEL_OK")
</pallas_src>

<mosaic_0001>
module attributes {stable_mosaic.version = 11 : i64} {
  func.func @_gcn_agg_kernel(%arg0: i32, %arg1: i32, %arg2: memref<128x128xbf16, #tpu.memory_space<vmem>>, %arg3: memref<256x128xbf16, #tpu.memory_space<vmem>>, %arg4: memref<128x128xf32, #tpu.memory_space<vmem>>, %arg5: memref<128x128xf32, #tpu.memory_space<vmem>>) attributes {dimension_semantics = [#tpu.dimension_semantics<parallel>, #tpu.dimension_semantics<arbitrary>], iteration_bounds = array<i64: 2, 2>, scalar_prefetch = 0 : i64, scratch_operands = 1 : i64, tpu.core_type = #tpu.core_type<tc>, window_params = [{transform_indices = @transform_0, window_bounds = array<i64: 128, 128>}, {pipeline_mode = #tpu.pipeline_mode<synchronous>, transform_indices = @transform_1, window_bounds = array<i64: 256, 128>}, {transform_indices = @transform_2, window_bounds = array<i64: 128, 128>}]} {
    %c0_i32 = arith.constant 0 : i32
    %0 = arith.cmpi eq, %arg1, %c0_i32 : i32
    %1 = arith.extui %0 : i1 to i32
    %c0_i32_0 = arith.constant 0 : i32
    %2 = arith.cmpi ne, %1, %c0_i32_0 : i32
    scf.if %2 {
      %cst_8 = arith.constant 0.000000e+00 : f32
      %15 = vector.broadcast %cst_8 : f32 to vector<128x128xf32>
      %c0_9 = arith.constant 0 : index
      %c0_10 = arith.constant 0 : index
      %16 = vector.load %arg5[%c0_9, %c0_10] : memref<128x128xf32, #tpu.memory_space<vmem>>, vector<128x128xf32>
      tpu.vector_store %arg5[%c0_9, %c0_10], %15 {strides = array<i32>} : memref<128x128xf32, #tpu.memory_space<vmem>>, vector<128x128xf32>,
    } else {
    }
    %c128_i32 = arith.constant 128 : i32
    %3 = arith.muli %arg1, %c128_i32 : i32
    %4 = tpu.assume_multiple %3, 128 : i32
    %5 = arith.index_cast %4 : i32 to index
    %c0 = arith.constant 0 : index
    %6 = vector.load %arg3[%5, %c0] : memref<256x128xbf16, #tpu.memory_space<vmem>>, vector<128x128xbf16>
    %c0_1 = arith.constant 0 : index
    %c0_2 = arith.constant 0 : index
    %7 = vector.load %arg5[%c0_1, %c0_2] : memref<128x128xf32, #tpu.memory_space<vmem>>, vector<128x128xf32>
    %c0_3 = arith.constant 0 : index
    %c0_4 = arith.constant 0 : index
    %8 = vector.load %arg2[%c0_3, %c0_4] : memref<128x128xbf16, #tpu.memory_space<vmem>>, vector<128x128xbf16>
    %cst = arith.constant dense<0.000000e+00> : vector<128x128xf32>
    %9 = tpu.matmul %8, %6, %cst {dimension_numbers = #tpu.dot_dimension_numbers<[1], [0], [0], [1], [0, 0, 1, 1], [], []>} : vector<128x128xbf16>, vector<128x128xbf16>, vector<128x128xf32> -> vector<128x128xf32>
    %10 = arith.addf %7, %9 : vector<128x128xf32>
    %c0_5 = arith.constant 0 : index
    %c0_6 = arith.constant 0 : index
    %11 = vector.load %arg5[%c0_5, %c0_6] : memref<128x128xf32, #tpu.memory_space<vmem>>, vector<128x128xf32>
    tpu.vector_store %arg5[%c0_5, %c0_6], %10 {strides = array<i32>} : memref<128x128xf32, #tpu.memory_space<vmem>>, vector<128x128xf32>,
    %c1_i32 = arith.constant 1 : i32
    %12 = arith.cmpi eq, %arg1, %c1_i32 : i32
    %13 = arith.extui %12 : i1 to i32
    %c0_i32_7 = arith.constant 0 : i32
    %14 = arith.cmpi ne, %13, %c0_i32_7 : i32
    scf.if %14 {
      %c0_8 = arith.constant 0 : index
      %c0_9 = arith.constant 0 : index
      %15 = vector.load %arg5[%c0_8, %c0_9] : memref<128x128xf32, #tpu.memory_space<vmem>>, vector<128x128xf32>
      %16 = arith.mulf %15, %15 : vector<128x128xf32>
      %cst_10 = arith.constant dense<0.000000e+00> : vector<128xf32>
      %17 = vector.multi_reduction <add>, %16, %cst_10 [1] : vector<128x128xf32> to vector<128xf32>
      %18 = vector.shape_cast %17 : vector<128xf32> to vector<128x1xf32>
      %cst_11 = arith.constant 1.000000e-24 : f32
      %19 = vector.broadcast %cst_11 : f32 to vector<128x1xf32>
      %20 = arith.maximumf %18, %19 : vector<128x1xf32>
      %21 = math.rsqrt %20 : vector<128x1xf32>
      %22 = vector.broadcast %21 : vector<128x1xf32> to vector<128x128xf32>
      %23 = arith.mulf %15, %22 : vector<128x128xf32>
      %cst_12 = arith.constant 0.000000e+00 : f32
      %24 = vector.broadcast %cst_12 : f32 to vector<128x128xf32>
      %25 = arith.maximumf %23, %24 : vector<128x128xf32>
      %c0_13 = arith.constant 0 : index
      %c0_14 = arith.constant 0 : index
      %26 = vector.load %arg4[%c0_13, %c0_14] : memref<128x128xf32, #tpu.memory_space<vmem>>, vector<128x128xf32>
      tpu.vector_store %arg4[%c0_13, %c0_14], %25 {strides = array<i32>} : memref<128x128xf32, #tpu.memory_space<vmem>>, vector<128x128xf32>,
    } else {
    }
    return
  }
  func.func @transform_0(%arg0: i32, %arg1: i32) -> (i32, i32) {
    %c0_i32 = arith.constant 0 : i32
    return %arg0, %arg1 : i32, i32
  }
  func.func @transform_1(%arg0: i32, %arg1: i32) -> (i32, i32) {
    %c0_i32 = arith.constant 0 : i32
    %c0_i32_0 = arith.constant 0 : i32
    %c0_i32_1 = arith.constant 0 : i32
    return %c0_i32, %c0_i32_0 : i32, i32
  }
  func.func @transform_2(%arg0: i32, %arg1: i32) -> (i32, i32) {
    %c0_i32 = arith.constant 0 : i32
    %c0_i32_0 = arith.constant 0 : i32
    return %arg0, %c0_i32 : i32, i32
  }
}

</mosaic_0001>

<bundles_post_ra>
// kernel: tpu_custom_call.1
= control target key start
LH: loop header
LB: loop body
LE: loop exit
PB: predicated region body
PF: predicated region fallthrough
CT: control target
= control target key end

     0   :  { %s1811_s0 = inlined_call_operand.hbm [shape: bf16[256,256], index: 0, kind: input, shape index: {}]   ;;  %s1812_s1 = inlined_call_operand.hbm [shape: bf16[256,128], index: 1, kind: input, shape index: {}]   ;;  %s1813_s2 = inlined_call_operand.hbm [shape: f32[256,128], index: 2, kind: output, shape index: {}]  }
   0x1   :  { %1823 = sst [smem:[#allocation18_spill]] %s1812_s1 }
   0x2   :  { %1824 = sst [smem:[#allocation19_spill]] %s1813_s2 }
   0x3   :  { %7 = vsyncpa [#allocation4], 0 }
   0x4   :  { %9 = vsyncpa [#allocation4 + $0x1], 0 }
   0x5   :  { %10 = vsyncpa [#allocation7], 0 }
   0x6   :  { %11 = vsyncpa [#allocation5], 0 }
   0x7   :  { %13 = vsyncpa [#allocation5 + $0x1], 0  ;;  %s1344_s9 = smov 0   ;;  %s1346_s10 = smov 0  }
   0x8   :  { %s1348_s11 = smov 0   ;;  %s1350_s12 = smov 0  }
   0x9   :  { %s1352_s13 = smov 0   ;;  %s1354_s14 = smov 0  }
   0xa   :  { %s1356_s15 = smov 0   ;;  %s1358_s16 = smov 0  }
   0xb   :  { %s1360_s17 = smov 0   ;;  %s1362_s18 = smov 0  }
   0xc   :  { %s1364_s19 = smov 0  }
   0xd LB: > { %1825 = sst [smem:[#allocation12_spill]] %s1280_s9  ;;  %s855_s20 = sadd.s32 4294967295, %s1320_s19   ;;  %s1320_s19 = sphi %s1364_s19, %s19_s19   ;;  %s1316_s18 = sphi %s1362_s18, %s1856_s18   ;;  %s1312_s17 = sphi %s1360_s17, %s1855_s17   ;;  %s1308_s16 = sphi %s1358_s16, %s1854_s16   ;;  %s1304_s15 = sphi %s1356_s15, %s1853_s15   ;;  %s1300_s14 = sphi %s1354_s14, %s1852_s14   ;;  %s1296_s13 = sphi %s1352_s13, %s1851_s13   ;;  %s1292_s12 = sphi %s1350_s12, %s1850_s12   ;;  %s1288_s11 = sphi %s1348_s11, %s1849_s11   ;;  %s1284_s10 = sphi %s1346_s10, %s1848_s10   ;;  %s1280_s9 = sphi %s1344_s9, %s1847_s9  }
   0xe   : > { %1826 = sst [smem:[#allocation13_spill]] %s1308_s16  ;;  %s856_s21 = sadd.s32 4294967294, %s1320_s19  }
   0xf   : > { %p53_p0 = scmp.ne.s32.totalorder %s1296_s13, %s1292_s12  ;;  %p1400_p1 = scmp.eq.s32.totalorder %s855_s20, 0 }
  0x10   : > { %p97_p2 = scmp.ne.s32.totalorder %s1288_s11, %s1284_s10  ;;  %p98_p3 = scmp.eq.s32.totalorder %s855_s20, 3 }
  0x11   : > { %p1408_p4 = por %p1400_p1, %p53_p0  ;;  %p103_p5 = scmp.ne.s32.totalorder %s1284_s10, %s1280_s9 }
  0x12   : > { %p1414_p6 = por %p98_p3, %p97_p2  ;;  %p104_p7 = scmp.eq.s32.totalorder %s856_s21, 3 }
  0x13   : > { %p857_p8 = scmp.ge.s32.totalorder %s1320_s19, 1  ;;  %p111_p9 = scmp.lt.s32.totalorder %s1320_s19, 5 }
  0x14   : > { %s1829_s24 = scalar_select %p1414_p6, 1, 0 }
  0x15   : > { %p1420_p10 = por %p104_p7, %p103_p5  ;;  %p1424_p11 = pnand %p857_p8, %p111_p9 }
  0x16   : > { %1830 = sst [smem:[#allocation14_spill]] %s1829_s24  ;;  %s1322_s30 = smov [#allocation6]  }
  0x17   : > { %s1831_s25 = scalar_select %p1420_p10, 1, 0 }
  0x18   : > { %s1834_s1 = sld [smem:[#allocation18_spill]]  ;;  %p991_p12 = pneg %p1424_p11 }
  0x19   : > { %1832 = sst [smem:[#allocation15_spill]] %s1831_s25  ;;  %s124_s3 = sshll.u32 %s1322_s30, 4  ;;  %s125_s3 = int_to_ptr.vmem [resolvable:$true] %s124_s3 }
  0x1a   : > { %p992_p13 = pnand %p991_p12, %p1400_p1  ;;  %s1814_s4 = smov 64  }
  0x1b   : > { %s1815_s5 = smov 4   ;;  %s28_s6 = sadd.s32 1, %s1312_s17 }
  0x1c   : > { %s31_s7 = sadd.s32 1, %s1316_s18  ;;  %p29_p0 = scmp.ge.s32.totalorder %s28_s6, 2 }
  0x1d   : > { %s40_s8 = sadd.s32 1, %s1300_s14  ;;  %p47_p2 = scmp.ne.s32.totalorder %s1300_s14, %s1296_s13 }
  0x1e   : > { %s122_s29 = sshll.u32 %s1834_s1, 4  ;;  %p48_p3 = scmp.eq.s32.totalorder %s1320_s19, 0  ;;  %s123_s29 = int_to_ptr.hbm [resolvable:$true] %s122_s29 }
  0x1f   : > { %994 = dma.hbm_to_vmem [thread:$0]  (!%p992_p13), %s123_s29, 2048, %s125_s3, [#allocation7], %s1814_s4, %s1814_s4, %s1815_s5  }
  0x20   : > { %s1858_s6 = smov (%p29_p0, %s28_s6), 0  ;;  %s1860_s7 = smov (!%p29_p0, %s31_s7), %s1316_s18 }
  0x21   : > { %1835 = sst [smem:[#allocation16_spill]] %s1858_s6  ;;  %s36_s12 = ssub.s32 %s1312_s17, %s1858_s6 }
  0x22   : > { %p1449_p5 = por %p48_p3, %p47_p2  ;;  %p33_p7 = scmp.ge.s32.totalorder %s1860_s7, 2 }
  0x23   : > { %s87_s21 = sadd.s32 1, %s1288_s11  ;;  %p1004_p8 = scmp.lt.s32.totalorder %s1320_s19, 4 }
  0x24   : > { %s138_s27 = sand.u32 1, %s1300_s14   ;;  %s1862_s7 = smov (%p33_p7, %s1860_s7), 0 }
  0x25   : > { %1837 = sst [smem:[#allocation17_spill]] %s1862_s7  ;;  %s860_s28 = sshll.u32 %s138_s27, 6 }
  0x26   : > { %s35_s29 = ssub.s32 %s1316_s18, %s1862_s7  ;;  %s941_s3 = sshll.u32 %s1316_s18, 5 }
  0x27   : > { %s37_s30 = sor.u32 %s36_s12, %s35_s29  ;;  %p85_p9 = scmp.eq.s32.totalorder %s35_s29, 0 }
  0x28   : > { %p38_p12 = scmp.eq.s32.totalorder %s37_s30, 0  ;;  %s147_s1 = sadd.s32 %s1312_s17, %s941_s3 }
  0x29   : > { %s1462_s4 = scalar_select %p85_p9, %s1288_s11, %s87_s21  }
  0x2a   : > { %s1465_s5 = scalar_select %p38_p12, %s1300_s14, %s40_s8  }
  0x2b   : > { %s142_s6 = scalar_lea.vmem [#allocation3], %s860_s28  ;;  %s863_s9 = sshll.u32 %s147_s1, 2 }
  0x2c   : > { %s152_s25 = sshll.u32 %s142_s6, 4  ;;  %s149_s16 = scalar_lea.hbm %s1811_s0, %s863_s9  ;;  %s153_s25 = int_to_ptr.vmem [resolvable:$true] %s152_s25 }
  0x2d   : > { %p996_p13 = pnand %p1004_p8, %p1449_p5  ;;  %s150_s12 = sshll.u32 %s149_s16, 4  ;;  %s151_s12 = int_to_ptr.hbm [resolvable:$true] %s150_s12 }
  0x2e   : > { %s139_s29 = scalar_lea.sflag [#allocation4], %s138_s27  ;;  %s1325_s30 = smov 128  }
  0x2f   : > { %s1838_s21 = smov 4   ;;  %s1839_s7 = smov 64  }
  0x30   : > { %998 = dma.hbm_to_vmem [thread:$0]  (!%p996_p13), %s151_s12, 1024, %s153_s25, %s139_s29, %s1325_s30, %s1839_s7, %s1838_s21  }
  0x31   : > { %164 = sbr.rel (%p1424_p11) target bundleno = 490 (0x1ea), region = 28  ;;  %s166_s1 = sand.u32 (!%p1424_p11), 1, %s1296_s13  }
  0x32   : > { %s865_s6 = sshll.u32 (!%p1424_p11), %s166_s1, 6  ;;  %s167_s8 = scalar_lea.sflag (!%p1424_p11), [#allocation4], %s166_s1 }
  0x33   : > { %s1480_s2 = scalar_lea.vmem (!%p1424_p11), [#allocation3], %s865_s6 }
  0x36   : > { %1267 = dma.done.wait (%p1408_p4), %s167_s8, 1024  }
  0x37   : > { %1269 = vsyncadd (%p1408_p4), %s167_s8, 4294966272 }
  0x38   : > { %1271 = dma.done.wait (%p1400_p1), [#allocation7], 2048  }
  0x39   : > { %1273 = vsyncadd (%p1400_p1), [#allocation7], 4294965248  ;;  %s194_s9 = sand.u32 1, %s1284_s10   ;;  %p868_p11 = scmp.ne.s32.totalorder %s1304_s15, 0 }
  0x3a   : > { %s867_s16 = sshll.u32 %s194_s9, 7 }
  0x3b   : > { %s1493_s24 = scalar_lea.vmem [#allocation8], %s867_s16  ;;  %202 = sbr.rel (%p868_p11) target bundleno = 81 (0x51), region = 40 }
  0x40   : > { %v1326_v0 = vmov 0.0  }
  0x41   : > { %203 = vst [vmem:[#allocation2 + $0x30] sm:$0xff] %v1326_v0 }
  0x42   : > { %204 = vst [vmem:[#allocation2] sm:$0xff] %v1326_v0 }
  0x43   : > { %205 = vst [vmem:[#allocation2 + $0x58] sm:$0xff] %v1326_v0 }
  0x44   : > { %206 = vst [vmem:[#allocation2 + $0x18] sm:$0xff] %v1326_v0 }
  0x45   : > { %207 = vst [vmem:[#allocation2 + $0x50] sm:$0xff] %v1326_v0 }
  0x46   : > { %208 = vst [vmem:[#allocation2 + $0x68] sm:$0xff] %v1326_v0 }
  0x47   : > { %209 = vst [vmem:[#allocation2 + $0x8] sm:$0xff] %v1326_v0 }
  0x48   : > { %210 = vst [vmem:[#allocation2 + $0x48] sm:$0xff] %v1326_v0 }
  0x49   : > { %211 = vst [vmem:[#allocation2 + $0x40] sm:$0xff] %v1326_v0 }
  0x4a   : > { %212 = vst [vmem:[#allocation2 + $0x20] sm:$0xff] %v1326_v0 }
  0x4b   : > { %213 = vst [vmem:[#allocation2 + $0x10] sm:$0xff] %v1326_v0 }
  0x4c   : > { %214 = vst [vmem:[#allocation2 + $0x38] sm:$0xff] %v1326_v0 }
  0x4d   : > { %215 = vst [vmem:[#allocation2 + $0x60] sm:$0xff] %v1326_v0 }
  0x4e   : > { %216 = vst [vmem:[#allocation2 + $0x70] sm:$0xff] %v1326_v0 }
  0x4f   : > { %217 = vst [vmem:[#allocation2 + $0x78] sm:$0xff] %v1326_v0 }
  0x50   : > { %218 = vst [vmem:[#allocation2 + $0x28] sm:$0xff] %v1326_v0 }
  0x51 PF: > { %s869_s22 = sshll.u32 %s1304_s15, 7  ;;  %v950_v9 = vld [vmem:[%s1480_s2] sm:$0xff]  ;;  %v952_v10 = vld [vmem:[%s1480_s2 + $0x10] sm:$0xff]  ;;  %v951_v13 = vld [vmem:[%s1480_s2 + $0x8] sm:$0xff]  ;;  %p935_p1 = scmp.ne.s32.totalorder %s1304_s15, 1 }
  0x52   : > { %s220_s23 = sshra.s32 %s869_s22, 3  ;;  %v954_v11 = vld [vmem:[%s1480_s2 + $0x20] sm:$0xff]  ;;  %v956_v12 = vld [vmem:[%s1480_s2 + $0x30] sm:$0xff]  ;;  %v953_v14 = vld [vmem:[%s1480_s2 + $0x18] sm:$0xff] }
  0x53   : > { %s870_s25 = sshll.u32 %s220_s23, 2  ;;  %v955_v15 = vld [vmem:[%s1480_s2 + $0x28] sm:$0xff]  ;;  %v957_v16 = vld [vmem:[%s1480_s2 + $0x38] sm:$0xff]  ;;  %v240_v17 = vld [vmem:[#allocation2 + $0x30] sm:$0xff] }
  0x54   : > { %s1497_s26 = scalar_lea.vmem [#allocation6], %s870_s25  ;;  %v244_v18 = vld [vmem:[#allocation2 + $0x50] sm:$0xff]  ;;  %v248_v23 = vld [vmem:[#allocation2 + $0x40] sm:$0xff]  ;;  %v245_v26 = vld [vmem:[#allocation2 + $0x68] sm:$0xff] }
  0x55   : > { %v949_v1 = vld [vmem:[%s1497_s26 + $0x38] sm:$0xff]  ;;  %v948_v2 = vld [vmem:[%s1497_s26 + $0x30] sm:$0xff]  ;;  %v947_v3 = vld [vmem:[%s1497_s26 + $0x28] sm:$0xff] }
  0x56   : > { %368 = vmatpush.bf16.msra.mxu0 %v949_v1  ;;  %959 = vmatpush.bf16.msra.mxu1 %v949_v1  ;;  %v946_v4 = vld [vmem:[%s1497_s26 + $0x20] sm:$0xff]  ;;  %v945_v5 = vld [vmem:[%s1497_s26 + $0x18] sm:$0xff]  ;;  %v944_v6 = vld [vmem:[%s1497_s26 + $0x10] sm:$0xff] }
  0x57   : > { %960 = vmatpush.bf16.msra.mxu2 %v949_v1  ;;  %961 = vmatpush.bf16.msra.mxu3 %v949_v1  ;;  %v943_v7 = vld [vmem:[%s1497_s26 + $0x8] sm:$0xff]  ;;  %v942_v8 = vld [vmem:[%s1497_s26] sm:$0xff]  ;;  %v253_v36 = vld [vmem:[#allocation2 + $0x70] sm:$0xff] }
  0x58   : > { %v252_v24 = vld [vmem:[#allocation2 + $0x60] sm:$0xff]  ;;  %v242_v37 = vld [vmem:[#allocation2 + $0x58] sm:$0xff]  ;;  %v246_v38 = vld [vmem:[#allocation2 + $0x8] sm:$0xff] }
  0x59   : > { %v241_v25 = vld [vmem:[#allocation2] sm:$0xff]  ;;  %v250_v47 = vld [vmem:[#allocation2 + $0x10] sm:$0xff]  ;;  %v254_v48 = vld [vmem:[#allocation2 + $0x78] sm:$0xff] }
  0x5a   : > { %369 = vmatpush.bf16.msra.mxu0 %v948_v2  ;;  %962 = vmatpush.bf16.msra.mxu1 %v948_v2  ;;  %v249_v35 = vld [vmem:[#allocation2 + $0x20] sm:$0xff]  ;;  %v243_v49 = vld [vmem:[#allocation2 + $0x18] sm:$0xff]  ;;  %v247_v50 = vld [vmem:[#allocation2 + $0x48] sm:$0xff] }
  0x5b   : > { %963 = vmatpush.bf16.msra.mxu2 %v948_v2  ;;  %964 = vmatpush.bf16.msra.mxu3 %v948_v2  ;;  %v251_v59 = vld [vmem:[#allocation2 + $0x38] sm:$0xff]  ;;  %v255_v60 = vld [vmem:[#allocation2 + $0x28] sm:$0xff] }
  0x5e   : > { %370 = vmatpush.bf16.msra.mxu0 %v947_v3  ;;  %965 = vmatpush.bf16.msra.mxu1 %v947_v3 }
  0x5f   : > { %966 = vmatpush.bf16.msra.mxu2 %v947_v3  ;;  %967 = vmatpush.bf16.msra.mxu3 %v947_v3 }
  0x62   : > { %371 = vmatpush.bf16.msra.mxu0 %v946_v4  ;;  %968 = vmatpush.bf16.msra.mxu1 %v946_v4 }
  0x63   : > { %969 = vmatpush.bf16.msra.mxu2 %v946_v4  ;;  %970 = vmatpush.bf16.msra.mxu3 %v946_v4 }
  0x66   : > { %372 = vmatpush.bf16.msra.mxu0 %v945_v5  ;;  %971 = vmatpush.bf16.msra.mxu1 %v945_v5 }
  0x67   : > { %972 = vmatpush.bf16.msra.mxu2 %v945_v5  ;;  %973 = vmatpush.bf16.msra.mxu3 %v945_v5 }
  0x6a   : > { %373 = vmatpush.bf16.msra.mxu0 %v944_v6  ;;  %974 = vmatpush.bf16.msra.mxu1 %v944_v6 }
  0x6b   : > { %975 = vmatpush.bf16.msra.mxu2 %v944_v6  ;;  %976 = vmatpush.bf16.msra.mxu3 %v944_v6 }
  0x6e   : > { %374 = vmatpush.bf16.msra.mxu0 %v943_v7  ;;  %977 = vmatpush.bf16.msra.mxu1 %v943_v7 }
  0x6f   : > { %978 = vmatpush.bf16.msra.mxu2 %v943_v7  ;;  %979 = vmatpush.bf16.msra.mxu3 %v943_v7 }
  0x72   : > { %375 = vmatpush.bf16.msra.mxu0 %v942_v8  ;;  %980 = vmatpush.bf16.msra.mxu1 %v942_v8 }
  0x73   : > { %981 = vmatpush.bf16.msra.mxu2 %v942_v8  ;;  %982 = vmatpush.bf16.msra.mxu3 %v942_v8 }
  0x75   : > { %376 = vmatmul.bf16.vlgmr.msra.gmra.mxu0 %v950_v9  ;;  %386 = vmatmul.bf16.vlgmr.msra.gmra.mxu1 %v952_v10 }
  0x76   : > { %396 = vmatmul.bf16.vlgmr.msra.gmra.mxu2 %v954_v11  ;;  %406 = vmatmul.bf16.vlgmr.msra.gmra.mxu3 %v956_v12 }
  0x85   : > { %381 = vmatmul.bf16.gmra.mxu0 %v951_v13  ;;  %391 = vmatmul.bf16.gmra.mxu1 %v953_v14 }
  0x86   : > { %401 = vmatmul.bf16.gmra.mxu2 %v955_v15  ;;  %411 = vmatmul.bf16.gmra.mxu3 %v957_v16 }
  0xf2   : > { %v377_v19 = vpop.f32.mrf.mxu0  ;;  %v387_v20 = vpop.f32.mrf.mxu1 }
  0xf3   : > { %v417_v21 = vadd.f32 %v377_v19, %v240_v17  ;;  %v421_v22 = vadd.f32 %v387_v20, %v244_v18 }
  0xf5   : > { %433 = vst [vmem:[#allocation2 + $0x30] sm:$0xff] %v417_v21 }
  0xf6   : > { %437 = vst [vmem:[#allocation2 + $0x50] sm:$0xff] %v421_v22 }
  0xf9   : > { %v397_v27 = vpop.f32.mrf.mxu2  ;;  %v407_v28 = vpop.f32.mrf.mxu3 }
  0xfa   : > { %v425_v29 = vadd.f32 %v397_v27, %v248_v23  ;;  %v429_v30 = vadd.f32 %v407_v28, %v252_v24  ;;  %v379_v31 = vpop.f32.mrf.mxu0  ;;  %v389_v32 = vpop.f32.mrf.mxu1 }
  0xfb   : > { %v418_v33 = vadd.f32 %v379_v31, %v241_v25  ;;  %v422_v34 = vadd.f32 %v389_v32, %v245_v26 }
  0xfc   : > { %441 = vst [vmem:[#allocation2 + $0x40] sm:$0xff] %v425_v29 }
  0xfd   : > { %445 = vst [vmem:[#allocation2 + $0x60] sm:$0xff] %v429_v30 }
  0xfe   : > { %434 = vst [vmem:[#allocation2] sm:$0xff] %v418_v33 }
  0xff   : > { %438 = vst [vmem:[#allocation2 + $0x68] sm:$0xff] %v422_v34 }
 0x101   : > { %v399_v39 = vpop.f32.mrf.mxu2  ;;  %v409_v40 = vpop.f32.mrf.mxu3 }
 0x102   : > { %v426_v41 = vadd.f32 %v399_v39, %v249_v35  ;;  %v430_v42 = vadd.f32 %v409_v40, %v253_v36  ;;  %v382_v43 = vpop.f32.mrf.mxu0  ;;  %v392_v44 = vpop.f32.mrf.mxu1 }
 0x103   : > { %v419_v45 = vadd.f32 %v382_v43, %v242_v37  ;;  %v423_v46 = vadd.f32 %v392_v44, %v246_v38 }
 0x104   : > { %442 = vst [vmem:[#allocation2 + $0x20] sm:$0xff] %v426_v41 }
 0x105   : > { %446 = vst [vmem:[#allocation2 + $0x70] sm:$0xff] %v430_v42 }
 0x106   : > { %435 = vst [vmem:[#allocation2 + $0x58] sm:$0xff] %v419_v45 }
 0x107   : > { %439 = vst [vmem:[#allocation2 + $0x8] sm:$0xff] %v423_v46 }
 0x109   : > { %v402_v51 = vpop.f32.mrf.mxu2  ;;  %v412_v52 = vpop.f32.mrf.mxu3 }
 0x10a   : > { %v427_v53 = vadd.f32 %v402_v51, %v250_v47  ;;  %v431_v54 = vadd.f32 %v412_v52, %v254_v48  ;;  %v384_v55 = vpop.f32.mrf.mxu0  ;;  %v394_v56 = vpop.f32.mrf.mxu1 }
 0x10b   : > { %v420_v57 = vadd.f32 %v384_v55, %v243_v49  ;;  %v424_v58 = vadd.f32 %v394_v56, %v247_v50 }
 0x10c   : > { %443 = vst [vmem:[#allocation2 + $0x10] sm:$0xff] %v427_v53 }
 0x10d   : > { %447 = vst [vmem:[#allocation2 + $0x78] sm:$0xff] %v431_v54 }
 0x10e   : > { %436 = vst [vmem:[#allocation2 + $0x18] sm:$0xff] %v420_v57 }
 0x10f   : > { %440 = vst [vmem:[#allocation2 + $0x48] sm:$0xff] %v424_v58 }
 0x111   : > { %v404_v61 = vpop.f32.mrf.mxu2  ;;  %v414_v62 = vpop.f32.mrf.mxu3  ;;  %452 = sbr.rel (%p935_p1) target bundleno = 468 (0x1d4), region = 44 }
 0x112   : > { %v428_v63 = vadd.f32 %v404_v61, %v251_v59  ;;  %v432_v0 = vadd.f32 %v414_v62, %v255_v60 }
 0x114   : > { %444 = vst [vmem:[#allocation2 + $0x38] sm:$0xff] %v428_v63 }
 0x115   : > { %448 = vst [vmem:[#allocation2 + $0x28] sm:$0xff] %v432_v0 }
 0x116   : > { %v1516_v1 = vld [vmem:[#allocation2 + $0x50] sm:$0xff]  ;;  %v1518_v2 = vld [vmem:[#allocation2 + $0x58] sm:$0xff]  ;;  %v1528_v7 = vld [vmem:[#allocation2 + $0x68] sm:$0xff] }
 0x117   : > { %v1520_v3 = vld [vmem:[#allocation2 + $0x30] sm:$0xff]  ;;  %v473_v4 = vmul.f32 %v1516_v1, %v1516_v1  ;;  %v471_v5 = vmul.f32 %v1518_v2, %v1518_v2  ;;  %v1530_v8 = vld [vmem:[#allocation2 + $0x18] sm:$0xff]  ;;  %v1532_v9 = vld [vmem:[#allocation2] sm:$0xff]  ;;  %v474_v10 = vmul.f32 %v1528_v7, %v1528_v7 }
 0x118   : > { %v469_v6 = vmul.f32 %v1520_v3, %v1520_v3  ;;  %v472_v11 = vmul.f32 %v1530_v8, %v1530_v8  ;;  %v470_v12 = vmul.f32 %v1532_v9, %v1532_v9  ;;  %v1540_v13 = vld [vmem:[#allocation2 + $0x40] sm:$0xff]  ;;  %v1542_v14 = vld [vmem:[#allocation2 + $0x48] sm:$0xff]  ;;  %v1554_v20 = vld [vmem:[#allocation2 + $0x10] sm:$0xff] }
 0x119   : > { %493 = vadd.xlane.f32.xlu2 %v473_v4  ;;  %489 = vadd.xlane.f32.xlu1 %v471_v5  ;;  %v1544_v15 = vld [vmem:[#allocation2 + $0x8] sm:$0xff]  ;;  %v477_v16 = vmul.f32 %v1540_v13, %v1540_v13  ;;  %v476_v17 = vmul.f32 %v1542_v14, %v1542_v14  ;;  %v1556_v21 = vld [vmem:[#allocation2 + $0x20] sm:$0xff]  ;;  %v479_v23 = vmul.f32 %v1554_v20, %v1554_v20  ;;  %v1564_v25 = vld [vmem:[#allocation2 + $0x78] sm:$0xff] }
 0x11a   : > { %485 = vadd.xlane.f32.xlu0 %v469_v6  ;;  %v475_v18 = vmul.f32 %v1544_v15, %v1544_v15  ;;  %v478_v24 = vmul.f32 %v1556_v21, %v1556_v21  ;;  %v1566_v26 = vld [vmem:[#allocation2 + $0x70] sm:$0xff]  ;;  %v1568_v27 = vld [vmem:[#allocation2 + $0x60] sm:$0xff]  ;;  %v483_v28 = vmul.f32 %v1564_v25, %v1564_v25 }
 0x11b   : > { %v1552_v19 = vld [vmem:[#allocation2 + $0x38] sm:$0xff]  ;;  %v482_v29 = vmul.f32 %v1566_v26, %v1566_v26  ;;  %v481_v30 = vmul.f32 %v1568_v27, %v1568_v27 }
 0x11c   : > { %v480_v22 = vmul.f32 %v1552_v19, %v1552_v19  ;;  %v1576_v31 = vld [vmem:[#allocation2 + $0x28] sm:$0xff] }
 0x11d   : > { %v484_v32 = vmul.f32 %v1576_v31, %v1576_v31 }
 0x121   : > { %495 = vadd.xlane.f32.xlu2 %v474_v10  ;;  %491 = vadd.xlane.f32.xlu1 %v472_v11 }
 0x122   : > { %487 = vadd.xlane.f32.xlu0 %v470_v12 }
 0x129   : > { %501 = vadd.xlane.f32.xlu2 %v477_v16  ;;  %499 = vadd.xlane.f32.xlu1 %v476_v17 }
 0x12a   : > { %497 = vadd.xlane.f32.xlu0 %v475_v18 }
 0x131   : > { %507 = vadd.xlane.f32.xlu2 %v480_v22  ;;  %505 = vadd.xlane.f32.xlu1 %v479_v23 }
 0x132   : > { %503 = vadd.xlane.f32.xlu0 %v478_v24 }
 0x139   : > { %513 = vadd.xlane.f32.xlu2 %v483_v28  ;;  %511 = vadd.xlane.f32.xlu1 %v482_v29 }
 0x13a   : > { %509 = vadd.xlane.f32.xlu0 %v481_v30 }
 0x142   : > { %515 = vadd.xlane.f32.xlu0 %v484_v32 }
 0x18c   : > { %v494_v33 = vpop.xlane.xlu2 %493  ;;  %v490_v34 = vpop.xlane.xlu1 %489 }
 0x18d   : > { %v521_v35 = vmax.f32 %v494_v33, 1e-24  ;;  %v519_v36 = vmax.f32 %v490_v34, 1e-24  ;;  %v486_v37 = vpop.xlane.xlu0 %485 }
 0x18e   : > { %v517_v38 = vmax.f32 %v486_v37, 1e-24 }
 0x18f   : > { %1102 = vrsqrt.f32 %v521_v35  ;;  %vm579_vm0 = vweird.f32 %v521_v35  ;;  %vm559_vm1 = vweird.f32 %v519_v36 }
 0x190   : > { %1104 = vrsqrt.f32 %v519_v36  ;;  %vm539_vm3 = vweird.f32 %v517_v38 }
 0x191   : > { %1106 = vrsqrt.f32 %v517_v38 }
 0x194   : > { %v496_v39 = vpop.xlane.xlu2 %495  ;;  %v492_v40 = vpop.xlane.xlu1 %491 }
 0x195   : > { %v1103_v41 = vpop.eup %1102  ;;  %v1580_v42 = vmax.f32 %v496_v39, 1e-24  ;;  %v1582_v43 = vmax.f32 %v492_v40, 1e-24  ;;  %v488_v44 = vpop.xlane.xlu0 %487 }
 0x196   : > { %v1105_v45 = vpop.eup %1104  ;;  %v574_v46 = vmul.f32 %v1103_v41, %v521_v35  ;;  %v1584_v47 = vmax.f32 %v488_v44, 1e-24  ;;  %vm580_vm2 = vweird.f32 %v1103_v41 }
 0x197   : > { %v1107_v48 = vpop.eup %1106  ;;  %v554_v49 = vmul.f32 %v1105_v45, %v519_v36  ;;  %1108 = vrsqrt.f32 %v1580_v42  ;;  %vm560_vm4 = vweird.f32 %v1105_v45  ;;  %vm589_vm5 = vweird.f32 %v1580_v42  ;;  %vm581_vm7 = vmor %vm579_vm0, %vm580_vm2 }
 0x198   : > { %v575_v50 = vmul.f32 %v1103_v41, %v574_v46  ;;  %v534_v51 = vmul.f32 %v1107_v48, %v517_v38  ;;  %1110 = vrsqrt.f32 %v1582_v43  ;;  %vm540_vm6 = vweird.f32 %v1107_v48  ;;  %vm561_vm8 = vmor %vm559_vm1, %vm560_vm4 }
 0x199   : > { %v555_v52 = vmul.f32 %v1105_v45, %v554_v49  ;;  %1112 = vrsqrt.f32 %v1584_v47  ;;  %vm541_vm9 = vmor %vm539_vm3, %vm540_vm6  ;;  %vm569_vm10 = vweird.f32 %v1582_v43  ;;  %vm549_vm15 = vweird.f32 %v1584_v47 }
 0x19a   : > { %v576_v53 = vmul.f32 0.5, %v575_v50  ;;  %v535_v54 = vmul.f32 %v1107_v48, %v534_v51 }
 0x19b   : > { %v556_v55 = vmul.f32 0.5, %v555_v52 }
 0x19c   : > { %v577_v56 = vsub.f32 1.5, %v576_v53  ;;  %v536_v57 = vmul.f32 0.5, %v535_v54  ;;  %v502_v58 = vpop.xlane.xlu2 %501  ;;  %v500_v59 = vpop.xlane.xlu1 %499 }
 0x19d   : > { %v1589_v60 = vpop.eup %1108  ;;  %v557_v61 = vsub.f32 1.5, %v556_v55  ;;  %v1592_v62 = vmax.f32 %v502_v58, 1e-24  ;;  %v498_v63 = vpop.xlane.xlu0 %497  ;;  %v1605_v16 = vmax.f32 %v500_v59, 1e-24 }
 0x19e   : > { %v1594_v0 = vpop.eup %1110  ;;  %v578_v4 = vmul.f32 %v1103_v41, %v577_v56  ;;  %v537_v5 = vsub.f32 1.5, %v536_v57  ;;  %v584_v6 = vmul.f32 %v1589_v60, %v1580_v42  ;;  %vm590_vm11 = vweird.f32 %v1589_v60 }
 0x19f   : > { %v1598_v10 = vpop.eup %1112  ;;  %v558_v11 = vmul.f32 %v1105_v45, %v557_v61  ;;  %v564_v12 = vmul.f32 %v1594_v0, %v1582_v43  ;;  %1114 = vrsqrt.f32 %v1592_v62  ;;  %vm570_vm12 = vweird.f32 %v1594_v0  ;;  %vm591_vm14 = vmor %vm589_vm5, %vm590_vm11 }
 0x1a0   : > { %v582_v17 = vsel %vm581_vm7, %v1103_v41, %v578_v4  ;;  %v538_v18 = vmul.f32 %v1107_v48, %v537_v5  ;;  %v585_v22 = vmul.f32 %v1589_v60, %v584_v6  ;;  %v544_v23 = vmul.f32 %v1598_v10, %v1584_v47  ;;  %vm571_vm0 = vmor %vm569_vm10, %vm570_vm12 }
 0x1a1   : > { %v697_v24 = vmul.f32 %v582_v17, %v1516_v1  ;;  %v562_v28 = vsel %vm561_vm8, %v1105_v45, %v558_v11  ;;  %v565_v29 = vmul.f32 %v1594_v0, %v564_v12  ;;  %1116 = vrsqrt.f32 %v1605_v16 }
 0x1a2   : > { %v695_v30 = vmul.f32 %v562_v28, %v1518_v2  ;;  %v542_v32 = vsel %vm541_vm9, %v1107_v48, %v538_v18  ;;  %v586_v33 = vmul.f32 0.5, %v585_v22  ;;  %v545_v34 = vmul.f32 %v1598_v10, %v544_v23 }
 0x1a3   : > { %v713_v35 = vmax.f32 %v697_v24, 0.0  ;;  %v693_v36 = vmul.f32 %v542_v32, %v1520_v3  ;;  %v566_v1 = vmul.f32 0.5, %v565_v29  ;;  %v1626_v3 = vmax.f32 %v498_v63, 1e-24 }
 0x1a4   : > { %v711_v37 = vmax.f32 %v695_v30, 0.0  ;;  %v587_v38 = vsub.f32 1.5, %v586_v33  ;;  %v546_v39 = vmul.f32 0.5, %v545_v34  ;;  %v508_v40 = vpop.xlane.xlu2 %507  ;;  %v506_v41 = vpop.xlane.xlu1 %505  ;;  %vm550_vm13 = vweird.f32 %v1598_v10 }
 0x1a5   : > { %v1622_v2 = vpop.eup %1114  ;;  %729 = vst [vmem:[%s1493_s24 + $0x20] sm:$0xff] %v713_v35  ;;  %v709_v44 = vmax.f32 %v693_v36, 0.0  ;;  %v567_v45 = vsub.f32 1.5, %v566_v1  ;;  %v504_v46 = vpop.xlane.xlu0 %503  ;;  %1118 = vrsqrt.f32 %v1626_v3  ;;  %v1641_v52 = vmax.f32 %v508_v40, 1e-24  ;;  %vm551_vm1 = vmor %vm549_vm15, %vm550_vm13 }
 0x1a6   : > { %727 = vst [vmem:[%s1493_s24 + $0x10] sm:$0xff] %v711_v37  ;;  %v588_v48 = vmul.f32 %v1589_v60, %v587_v38  ;;  %v547_v49 = vsub.f32 1.5, %v546_v39  ;;  %v614_v50 = vmul.f32 %v1622_v2, %v1592_v62  ;;  %v1650_v55 = vmax.f32 %v506_v41, 1e-24 }
 0x1a7   : > { %725 = vst [vmem:[%s1493_s24] sm:$0xff] %v709_v44  ;;  %v568_v51 = vmul.f32 %v1594_v0, %v567_v45  ;;  %1120 = vrsqrt.f32 %v1641_v52  ;;  %v1657_v57 = vpop.eup %1116  ;;  %vm619_vm2 = vweird.f32 %v1592_v62  ;;  %vm620_vm3 = vweird.f32 %v1622_v2 }
 0x1a8   : > { %v592_v53 = vsel %vm591_vm14, %v1589_v60, %v588_v48  ;;  %v548_v54 = vmul.f32 %v1598_v10, %v547_v49  ;;  %v615_v42 = vmul.f32 %v1622_v2, %v614_v50  ;;  %1122 = vrsqrt.f32 %v1650_v55  ;;  %vm621_vm4 = vmor %vm619_vm2, %vm620_vm3 }
 0x1a9   : > { %v698_v56 = vmul.f32 %v592_v53, %v1528_v7  ;;  %v572_v47 = vsel %vm571_vm0, %v1594_v0, %v568_v51  ;;  %v604_v61 = vmul.f32 %v1657_v57, %v1605_v16  ;;  %vm609_vm5 = vweird.f32 %v1605_v16 }
 0x1aa   : > { %v696_v43 = vmul.f32 %v572_v47, %v1530_v8  ;;  %v552_v58 = vsel %vm551_vm1, %v1598_v10, %v548_v54  ;;  %v616_v59 = vmul.f32 0.5, %v615_v42  ;;  %v1667_v8 = vmax.f32 %v504_v46, 1e-24 }
 0x1ab   : > { %v714_v60 = vmax.f32 %v698_v56, 0.0  ;;  %v694_v7 = vmul.f32 %v552_v58, %v1532_v9  ;;  %v1119_v6 = vpop.eup %1118  ;;  %v605_v11 = vmul.f32 %v1657_v57, %v604_v61  ;;  %vm599_vm6 = vweird.f32 %v1626_v3 }
 0x1ac   : > { %v712_v63 = vmax.f32 %v696_v43, 0.0  ;;  %v617_v0 = vsub.f32 1.5, %v616_v59  ;;  %v514_v4 = vpop.xlane.xlu2 %513  ;;  %v512_v5 = vpop.xlane.xlu1 %511  ;;  %v594_v17 = vmul.f32 %v1119_v6, %v1626_v3  ;;  %1124 = vrsqrt.f32 %v1667_v8 }
 0x1ad   : > { %730 = vst [vmem:[%s1493_s24 + $0x28] sm:$0xff] %v714_v60  ;;  %v710_v10 = vmax.f32 %v694_v7, 0.0  ;;  %v1671_v9 = vmax.f32 %v514_v4, 1e-24  ;;  %v1677_v18 = vmax.f32 %v512_v5, 1e-24  ;;  %v1679_v22 = vpop.eup %1120  ;;  %v510_v24 = vpop.xlane.xlu0 %509  ;;  %vm649_vm7 = vweird.f32 %v1641_v52 }
 0x1ae   : > { %728 = vst [vmem:[%s1493_s24 + $0x18] sm:$0xff] %v712_v63  ;;  %v618_v12 = vmul.f32 %v1622_v2, %v617_v0  ;;  %v606_v23 = vmul.f32 0.5, %v605_v11  ;;  %v1123_v28 = vpop.eup %1122  ;;  %v595_v30 = vmul.f32 %v1119_v6, %v594_v17  ;;  %v644_v32 = vmul.f32 %v1679_v22, %v1641_v52 }
 0x1af   : > { %726 = vst [vmem:[%s1493_s24 + $0x8] sm:$0xff] %v710_v10  ;;  %1126 = vrsqrt.f32 %v1671_v9  ;;  %vm610_vm8 = vweird.f32 %v1657_v57  ;;  %v634_v34 = vmul.f32 %v1123_v28, %v1650_v55  ;;  %vm639_vm9 = vweird.f32 %v1650_v55 }
 0x1b0   : > { %v622_v29 = vsel %vm621_vm4, %v1622_v2, %v618_v12  ;;  %v607_v33 = vsub.f32 1.5, %v606_v23  ;;  %v596_v35 = vmul.f32 0.5, %v595_v30  ;;  %v645_v36 = vmul.f32 %v1679_v22, %v644_v32  ;;  %vm611_vm10 = vmor %vm609_vm5, %vm610_vm8 }
 0x1b1   : > { %v701_v62 = vmul.f32 %v622_v29, %v1540_v13  ;;  %1128 = vrsqrt.f32 %v1677_v18  ;;  %v635_v38 = vmul.f32 %v1123_v28, %v634_v34  ;;  %v1700_v39 = vmax.f32 %v510_v24, 1e-24 }
 0x1b2   : > { %v608_v37 = vmul.f32 %v1657_v57, %v607_v33  ;;  %v1702_v13 = vpop.eup %1124  ;;  %v597_v40 = vsub.f32 1.5, %v596_v35  ;;  %vm600_vm11 = vweird.f32 %v1119_v6  ;;  %v646_v41 = vmul.f32 0.5, %v645_v36 }
 0x1b3   : > { %v717_v1 = vmax.f32 %v701_v62, 0.0  ;;  %vm679_vm12 = vweird.f32 %v1671_v9  ;;  %vm650_vm13 = vweird.f32 %v1679_v22  ;;  %v636_v45 = vmul.f32 0.5, %v635_v38  ;;  %vm601_vm14 = vmor %vm599_vm6, %vm600_vm11 }
 0x1b4   : > { %v612_v44 = vsel %vm611_vm10, %v1657_v57, %v608_v37  ;;  %v624_v46 = vmul.f32 %v1702_v13, %v1667_v8  ;;  %v598_v49 = vmul.f32 %v1119_v6, %v597_v40  ;;  %v647_v16 = vsub.f32 1.5, %v646_v41  ;;  %vm651_vm0 = vmor %vm649_vm7, %vm650_vm13 }
 0x1b5   : > { %v1127_v2 = vpop.eup %1126  ;;  %733 = vst [vmem:[%s1493_s24 + $0x40] sm:$0xff] %v717_v1  ;;  %v700_v48 = vmul.f32 %v612_v44, %v1542_v14  ;;  %v637_v51 = vsub.f32 1.5, %v636_v45  ;;  %vm640_vm15 = vweird.f32 %v1123_v28  ;;  %1130 = vrsqrt.f32 %v1700_v39  ;;  %v516_v59 = vpop.xlane.xlu0 %515 }
 0x1b6   : > { %v674_v50 = vmul.f32 %v1127_v2, %v1671_v9  ;;  %v625_v53 = vmul.f32 %v1702_v13, %v624_v46  ;;  %v602_v56 = vsel %vm601_vm14, %v1119_v6, %v598_v49  ;;  %v648_v47 = vmul.f32 %v1679_v22, %v647_v16  ;;  %vm641_vm1 = vmor %vm639_vm9, %vm640_vm15 }
 0x1b7   : > { %v1129_v54 = vpop.eup %1128  ;;  %v716_v42 = vmax.f32 %v700_v48, 0.0  ;;  %v699_v57 = vmul.f32 %v602_v56, %v1544_v15  ;;  %v638_v3 = vmul.f32 %v1123_v28, %v637_v51  ;;  %vm630_vm2 = vweird.f32 %v1702_v13 }
 0x1b8   : > { %v675_v14 = vmul.f32 %v1127_v2, %v674_v50  ;;  %v626_v43 = vmul.f32 0.5, %v625_v53  ;;  %v664_v58 = vmul.f32 %v1129_v54, %v1677_v18  ;;  %v652_v60 = vsel %vm651_vm0, %v1679_v22, %v648_v47 }
 0x1b9   : > { %732 = vst [vmem:[%s1493_s24 + $0x38] sm:$0xff] %v716_v42  ;;  %vm680_vm3 = vweird.f32 %v1127_v2  ;;  %v715_v7 = vmax.f32 %v699_v57, 0.0  ;;  %v704_v52 = vmul.f32 %v652_v60, %v1552_v19  ;;  %v642_v61 = vsel %vm641_vm1, %v1123_v28, %v638_v3 }
 0x1ba   : > { %v676_v15 = vmul.f32 0.5, %v675_v14  ;;  %v627_v63 = vsub.f32 1.5, %v626_v43  ;;  %v703_v0 = vmul.f32 %v642_v61, %v1554_v20  ;;  %v665_v5 = vmul.f32 %v1129_v54, %v664_v58  ;;  %vm681_vm6 = vmor %vm679_vm12, %vm680_vm3 }
 0x1bb   : > { %v532_v6 = vmax.f32 %v516_v59, 1e-24  ;;  %v1131_v10 = vpop.eup %1130  ;;  %731 = vst [vmem:[%s1493_s24 + $0x30] sm:$0xff] %v715_v7  ;;  %v720_v55 = vmax.f32 %v704_v52, 0.0  ;;  %vm629_vm4 = vweird.f32 %v1667_v8  ;;  %vm669_vm7 = vweird.f32 %v1677_v18 }
 0x1bc   : > { %v677_v4 = vsub.f32 1.5, %v676_v15  ;;  %v628_v11 = vmul.f32 %v1702_v13, %v627_v63  ;;  %v719_v12 = vmax.f32 %v703_v0, 0.0  ;;  %vm631_vm5 = vmor %vm629_vm4, %vm630_vm2  ;;  %v666_v17 = vmul.f32 0.5, %v665_v5 }
 0x1bd   : > { %v654_v22 = vmul.f32 %v1131_v10, %v1700_v39  ;;  %736 = vst [vmem:[%s1493_s24 + $0x58] sm:$0xff] %v720_v55  ;;  %vm670_vm8 = vweird.f32 %v1129_v54  ;;  %1132 = vrsqrt.f32 %v532_v6  ;;  %vm660_vm10 = vweird.f32 %v1131_v10 }
 0x1be   : > { %v678_v19 = vmul.f32 %v1127_v2, %v677_v4  ;;  %v632_v20 = vsel %vm631_vm5, %v1702_v13, %v628_v11  ;;  %735 = vst [vmem:[%s1493_s24 + $0x50] sm:$0xff] %v719_v12  ;;  %v667_v24 = vsub.f32 1.5, %v666_v17  ;;  %vm671_vm9 = vmor %vm669_vm7, %vm670_vm8  ;;  %vm659_vm11 = vweird.f32 %v1700_v39 }
 0x1bf   : > { %v702_v8 = vmul.f32 %v632_v20, %v1556_v21  ;;  %v655_v28 = vmul.f32 %v1131_v10, %v654_v22  ;;  %vm661_vm12 = vmor %vm659_vm11, %vm660_vm10  ;;  %vm689_vm14 = vweird.f32 %v532_v6 }
 0x1c0   : > { %v682_v23 = vsel %vm681_vm6, %v1127_v2, %v678_v19  ;;  %v668_v32 = vmul.f32 %v1129_v54, %v667_v24 }
 0x1c1   : > { %v707_v29 = vmul.f32 %v682_v23, %v1564_v25  ;;  %v718_v30 = vmax.f32 %v702_v8, 0.0  ;;  %v656_v62 = vmul.f32 0.5, %v655_v28 }
 0x1c2   : > { %v672_v9 = vsel %vm671_vm9, %v1129_v54, %v668_v32 }
 0x1c3   : > { %v723_v33 = vmax.f32 %v707_v29, 0.0  ;;  %734 = vst [vmem:[%s1493_s24 + $0x48] sm:$0xff] %v718_v30  ;;  %v657_v18 = vsub.f32 1.5, %v656_v62  ;;  %v1133_v34 = vpop.eup %1132  ;;  %v706_v21 = vmul.f32 %v672_v9, %v1566_v26 }
 0x1c4   : > { %v684_v36 = vmul.f32 %v1133_v34, %v532_v6  ;;  %vm690_vm13 = vweird.f32 %v1133_v34 }
 0x1c5   : > { %739 = vst [vmem:[%s1493_s24 + $0x70] sm:$0xff] %v723_v33  ;;  %v658_v35 = vmul.f32 %v1131_v10, %v657_v18  ;;  %v722_v25 = vmax.f32 %v706_v21, 0.0  ;;  %vm691_vm15 = vmor %vm689_vm14, %vm690_vm13 }
 0x1c6   : > { %v685_v37 = vmul.f32 %v1133_v34, %v684_v36 }
 0x1c7   : > { %v662_v1 = vsel %vm661_vm12, %v1131_v10, %v658_v35  ;;  %738 = vst [vmem:[%s1493_s24 + $0x68] sm:$0xff] %v722_v25 }
 0x1c8   : > { %v705_v38 = vmul.f32 %v662_v1, %v1568_v27  ;;  %v686_v13 = vmul.f32 0.5, %v685_v37 }
 0x1ca   : > { %v721_v40 = vmax.f32 %v705_v38, 0.0  ;;  %v687_v41 = vsub.f32 1.5, %v686_v13 }
 0x1cc   : > { %737 = vst [vmem:[%s1493_s24 + $0x60] sm:$0xff] %v721_v40  ;;  %v688_v2 = vmul.f32 %v1133_v34, %v687_v41 }
 0x1ce   : > { %v692_v26 = vsel %vm691_vm15, %v1133_v34, %v688_v2 }
 0x1cf   : > { %v708_v39 = vmul.f32 %v692_v26, %v1576_v31 }
 0x1d1   : > { %v724_v44 = vmax.f32 %v708_v39, 0.0 }
 0x1d3   : > { %740 = vst [vmem:[%s1493_s24 + $0x78] sm:$0xff] %v724_v44 }
 0x1d4 PF: > { %s1840_s15 = sld [smem:[#allocation13_spill]]  ;;  %s754_s29 = sshll.u32 %s1493_s24, 4  ;;  %s755_s29 = int_to_ptr.vmem [resolvable:$true] %s754_s29 }
 0x1d5   : > { %s1842_s3 = sld [smem:[#allocation19_spill]]  ;;  %s742_s21 = scalar_lea.sflag [#allocation5], %s194_s9 }
 0x1da   : > { %s958_s20 = sshll.u32 %s1840_s15, 7 }
 0x1db   : > { %s753_s12 = scalar_lea.hbm %s1842_s3, %s958_s20  ;;  %s1214_s16 = scalar_lea.hbm %s1842_s3, 256 }
 0x1dc   : > { %s756_s30 = sshll.u32 %s753_s12, 4  ;;  %s757_s30 = int_to_ptr.hbm [resolvable:$true] %s756_s30 }
 0x1dd   : > { %s1208_s1 = sshra.s32 %s757_s30, 4  ;;  %s1209_s1 = int_to_ptr.hbm [resolvable:$true] %s1208_s1 }
 0x1de   : > { %s1210_s6 = scalar_lea.hbm %s1209_s1, 128  ;;  %p1215_p3 = scmp.lt.s32.totalorder %s1209_s1, %s1842_s3 }
 0x1df   : > { %p1211_p4 = scmp.ne.s32.totalorder %s1209_s1, %s1210_s6  ;;  %p1216_p5 = scmp.lt.s32.totalorder %s1214_s16, %s1210_s6 }
 0x1e1   : > { %p1212_p0 = pnand %p1211_p4, %p1414_p6  ;;  %p1217_p7 = por %p1216_p5, %p1215_p3 }
 0x1e3   : > { %p1213_p2 = pneg %p1212_p0 }
 0x1e5   : > { %p1218_p8 = pnand %p1217_p7, %p1213_p2 }
 0x1e7   : > { %1221 = shalt.err (!%p1218_p8)
}
 0x1e8   : > { %s1327_s9 = smov 128   ;;  %s1328_s24 = smov 8  }
 0x1e9   : > { %989 = dma.vmem_to_hbm [thread:$0]  (%p1414_p6), %s755_s29, 2048, %s757_s30, %s742_s21, %s1327_s9, %s1327_s9, %s1328_s24  }
 0x1ea PF: > { %s1843_s25 = sld [smem:[#allocation12_spill]]  ;;  %p1006_p9 = scmp.ge.s32.totalorder %s1320_s19, 2 }
 0x1ec   : > { %p1000_p12 = pnand %p1006_p9, %p1420_p10 }
 0x1ee   : > { %p1001_p13 = pneg %p1000_p12 }
 0x1f0   : > { %s771_s15 = sand.u32 1, %s1843_s25  }
 0x1f1   : > { %s772_s20 = scalar_lea.sflag [#allocation5], %s771_s15 }
 0x1f2   : > { %1275 = dma.done.wait (%p1001_p13), %s772_s20, 2048  }
 0x1f3   : > { %1277 = vsyncadd (%p1001_p13), %s772_s20, 4294965248  ;;  %s19_s19 = sadd.s32 1, %s1320_s19   ;;  %s1845_s7 = sld [smem:[#allocation16_spill]] }
 0x1f4   : > { %p16_p11 = scmp.ge.s32.totalorder %s19_s19, 6   ;;  %s1846_s27 = sld [smem:[#allocation17_spill]] }
 0x1f5   : > { %s1847_s9 = smov %s1284_s10  ;;  %s1848_s10 = smov %s1288_s11 }
 0x1f6   : > { %s1849_s11 = smov %s1462_s4  ;;  %s1850_s12 = smov %s1296_s13 }
 0x1f7   : > { %s1851_s13 = smov %s1300_s14  ;;  %s1852_s14 = smov %s1465_s5 }
 0x1f8   : > { %s1853_s15 = smov %s1312_s17  ;;  %s1854_s16 = smov %s1316_s18 }
 0x1f9   : > { %s1855_s17 = smov %s1845_s7  ;;  %18 = sbr.rel (!%p16_p11) target bundleno = 13 (0xd), region = 86 }
 0x1fa   : > { %s1856_s18 = smov %s1846_s27 }
 0x1fe   :  { %778 = vsyncpa [#allocation4], 1 }
 0x1ff   :  { %780 = vsyncpa [#allocation4 + $0x1], 1 }
 0x200   :  { %781 = vsyncpa [#allocation7], 1 }
 0x201   :  { %782 = vsyncpa [#allocation5], 1 }
 0x202   :  { %784 = vsyncpa [#allocation5 + $0x1], 1 }

</bundles_post_ra>
